<compile_context>
chip_gen: v7x
topology: tpu7x:2x2x1
jax: 0.10.0
libtpu: 0.0.40
codegen_flags: <defaults>
</compile_context>

<pallas_src>
import math

import jax
import jax.numpy as jnp
from jax.experimental import pallas as pl
from jax.experimental.pallas import tpu as pltpu

_LANE = 128  # vreg lane width


def _scale_kernel(x_ref, s_ref, o_ref):
    # x_ref: (TM, D) tile in the input dtype; s_ref: (1, D) scale row in the
    # output dtype (kept resident via a constant index_map).  Promote x inside
    # the kernel; the (1, D) row broadcasts over sublanes on the VPU.
    o_ref[...] = x_ref[...].astype(o_ref.dtype) * s_ref[...]


def _tpu_budgets():
    """(per-tile byte budget, scoped vmem limit) tuned per TPU generation."""
    try:
        kind = jax.devices()[0].device_kind.lower()
    except Exception:  # pragma: no cover - defensive
        kind = ""
    if "7" in kind:                      # v7x: 64 MiB physical VMEM
        return 6 << 20, 32 << 20
    if "v5" in kind or "v6" in kind:     # v5e / v6e: 128 MiB physical VMEM
        return 14 << 20, 64 << 20
    return 6 << 20, 32 << 20             # unknown: conservative


def scale_forward(x: jax.Array, scale: jax.Array, *,
                  min_pallas_elements: int = 1 << 15) -> jax.Array:
    """Computes x * scale with scale of shape (dim,), broadcast over the last
    dim of x (PyTorch `x * self.scale` semantics, including dtype promotion)."""
    orig_shape = x.shape
    dim = scale.shape[-1]
    assert orig_shape[-1] == dim, "last dim of x must equal scale dim"

    out_dtype = jnp.promote_types(x.dtype, scale.dtype)
    s1d = scale.reshape(dim).astype(out_dtype)

    def _xla(v):
        return (v.astype(out_dtype) * s1d).astype(out_dtype)

    # Tiny inputs: a standalone pallas_call costs more than the data movement.
    if x.size < min_pallas_elements:
        return _xla(x).reshape(orig_shape)

    m = 1
    for s in orig_shape[:-1]:
        m *= s
    x2d = x.reshape(m, dim)

    tile_budget, vmem_limit = _tpu_budgets()
    in_item = jnp.dtype(x.dtype).itemsize
    out_item = jnp.dtype(out_dtype).itemsize
    pack = max(8, 32 // min(in_item, out_item))  # sublane multiple for both dtypes

    # --- lane-dense packing: fold k rows so the last dim is a multiple of 128 ---
    if dim % _LANE == 0:
        k = 1
        d_pack = dim
        s_row = s1d.reshape(1, d_pack)
    else:
        k = math.lcm(dim, _LANE) // dim
        d_pack = k * dim
        s_row = jnp.tile(s1d, k).reshape(1, d_pack)

    # Pathological fold widths (e.g. large prime dims): even a pack-row tile
    # would blow the VMEM budget -> let XLA handle it.
    # TODO(synk): could instead use an un-folded kernel with masked stores.
    bytes_per_row = d_pack * (in_item + out_item)
    if tile_budget // bytes_per_row < pack:
        return _xla(x).reshape(orig_shape)

    m_main = (m // k) * k
    if m_main == 0:
        return _xla(x).reshape(orig_shape)

    rows = m_main // k                       # rows of the lane-dense matrix
    xp = x2d[:m_main].reshape(rows, d_pack)  # contiguous view-style reshape

    # --- row tile: fill the byte budget, multiple of the sublane pack ---
    tm_cap = (tile_budget // bytes_per_row) // pack * pack
    tm = rows if rows <= tm_cap else tm_cap  # single exact block if it fits
    grid = (pl.cdiv(rows, tm),)              # ragged last block masked by Pallas

    out_main = pl.pallas_call(
        _scale_kernel,
        out_shape=jax.ShapeDtypeStruct((rows, d_pack), out_dtype),
        grid_spec=pltpu.PrefetchScalarGridSpec(
            num_scalar_prefetch=0,
            grid=grid,
            in_specs=[
                pl.BlockSpec((tm, d_pack), lambda i: (i, 0)),
                # constant index_map -> scale row DMA'd once, stays resident
                pl.BlockSpec((1, d_pack), lambda i: (0, 0)),
            ],
            out_specs=pl.BlockSpec((tm, d_pack), lambda i: (i, 0)),
        ),
        compiler_params=pltpu.CompilerParams(
            dimension_semantics=("parallel",),   # lets v7x shard rows over 2 TCs
            vmem_limit_bytes=vmem_limit,
        ),
    )(xp, s_row)

    out_main = out_main.reshape(m_main, dim)

    if m_main == m:
        return out_main.reshape(orig_shape)

    # < k leftover rows: tiny XLA epilogue instead of padding the whole array.
    out_rem = _xla(x2d[m_main:])
    return jnp.concatenate([out_main, out_rem], axis=0).reshape(orig_shape)


if __name__ == "__main__":
    key = jax.random.PRNGKey(0)
    k1, k2, k3, k4 = jax.random.split(key, 4)

    # Scale(dim=32): parameter is init_value * ones(dim); perturb deterministically
    # so the multiply is actually exercised.
    dim = 32
    init_value = 1.0
    scale_param = init_value * jnp.ones((dim,), dtype=jnp.float32)
    scale_param = scale_param + 0.01 * jnp.arange(dim, dtype=jnp.float32)

    # Case 1: (batch=2, seq=8, hidden=32), m=16 divisible by fold k=4 -> pure
    # folded Pallas path (force Pallas despite the small size).
    x = jax.random.normal(k1, (2, 8, dim), dtype=jnp.float32)
    out = jax.block_until_ready(scale_forward(x, scale_param, min_pallas_elements=0))
    ref = x * scale_param
    assert out.shape == x.shape and out.dtype == ref.dtype
    assert jnp.allclose(out, ref, atol=1e-6, rtol=1e-6)

    # Case 2: ragged M (15 rows, not divisible by k=4) -> Pallas main + XLA epilogue.
    x2 = jax.random.normal(k2, (5, 3, dim), dtype=jnp.float32)
    out2 = jax.block_until_ready(scale_forward(x2, scale_param, min_pallas_elements=0))
    assert jnp.allclose(out2, x2 * scale_param, atol=1e-6, rtol=1e-6)

    # Case 3: mixed dtype (bf16 x, f32 scale) -> promotion happens in-kernel,
    # output is f32 like PyTorch.
    x3 = jax.random.normal(k3, (2, 8, dim), dtype=jnp.bfloat16)
    out3 = jax.block_until_ready(scale_forward(x3, scale_param, min_pallas_elements=0))
    ref3 = x3.astype(jnp.float32) * scale_param
    assert out3.dtype == jnp.float32
    assert jnp.allclose(out3, ref3, atol=1e-6, rtol=1e-6)

    # Case 4: dim already a multiple of 128 -> no-fold path.
    dim4 = 128
    scale4 = 1.0 + 0.001 * jnp.arange(dim4, dtype=jnp.float32)
    x4 = jax.random.normal(k4, (2, 8, dim4), dtype=jnp.float32)
    out4 = jax.block_until_ready(scale_forward(x4, scale4, min_pallas_elements=0))
    assert jnp.allclose(out4, x4 * scale4, atol=1e-6, rtol=1e-6)

    # Case 5: default dispatch (tiny input -> plain XLA elementwise), same numbers.
    out5 = jax.block_until_ready(scale_forward(x, scale_param))
    assert jnp.allclose(out5, ref, atol=1e-6, rtol=1e-6)

    print("KERNEL_OK")
</pallas_src>

<mosaic_0001>
module attributes {stable_mosaic.version = 11 : i64} {
  func.func @_scale_kernel(%arg0: i32, %arg1: memref<4x128xf32, #tpu.memory_space<vmem>>, %arg2: memref<1x128xf32, #tpu.memory_space<vmem>>, %arg3: memref<4x128xf32, #tpu.memory_space<vmem>>) attributes {dimension_semantics = [#tpu.dimension_semantics<parallel>], iteration_bounds = array<i64: 1>, scalar_prefetch = 0 : i64, scratch_operands = 0 : i64, tpu.core_type = #tpu.core_type<tc>, window_params = [{transform_indices = @transform_0, window_bounds = array<i64: 4, 128>}, {pipeline_mode = #tpu.pipeline_mode<synchronous>, transform_indices = @transform_1, window_bounds = array<i64: 1, 128>}, {transform_indices = @transform_2, window_bounds = array<i64: 4, 128>}]} {
    %c0 = arith.constant 0 : index
    %c0_0 = arith.constant 0 : index
    %0 = vector.load %arg1[%c0, %c0_0] : memref<4x128xf32, #tpu.memory_space<vmem>>, vector<4x128xf32>
    %c0_1 = arith.constant 0 : index
    %c0_2 = arith.constant 0 : index
    %1 = vector.load %arg2[%c0_1, %c0_2] : memref<1x128xf32, #tpu.memory_space<vmem>>, vector<1x128xf32>
    %2 = vector.broadcast %1 : vector<1x128xf32> to vector<4x128xf32>
    %3 = arith.mulf %0, %2 : vector<4x128xf32>
    %c0_3 = arith.constant 0 : index
    %c0_4 = arith.constant 0 : index
    %4 = vector.load %arg3[%c0_3, %c0_4] : memref<4x128xf32, #tpu.memory_space<vmem>>, vector<4x128xf32>
    tpu.vector_store %arg3[%c0_3, %c0_4], %3 {strides = array<i32>} : memref<4x128xf32, #tpu.memory_space<vmem>>, vector<4x128xf32>,
    return
  }
  func.func @transform_0(%arg0: i32) -> (i32, i32) {
    %c0_i32 = arith.constant 0 : i32
    %c0_i32_0 = arith.constant 0 : i32
    return %arg0, %c0_i32 : i32, i32
  }
  func.func @transform_1(%arg0: i32) -> (i32, i32) {
    %c0_i32 = arith.constant 0 : i32
    %c0_i32_0 = arith.constant 0 : i32
    %c0_i32_1 = arith.constant 0 : i32
    return %c0_i32, %c0_i32_0 : i32, i32
  }
  func.func @transform_2(%arg0: i32) -> (i32, i32) {
    %c0_i32 = arith.constant 0 : i32
    %c0_i32_0 = arith.constant 0 : i32
    return %arg0, %c0_i32 : i32, i32
  }
}

</mosaic_0001>

<bundles_post_ra>
// kernel: tpu_custom_call.1
= control target key start
LH: loop header
LB: loop body
LE: loop exit
PB: predicated region body
PF: predicated region fallthrough
CT: control target
= control target key end

     0   :  { %7 = vsyncpa [#allocation3], 0  ;;  %s144_s0 = inlined_call_operand.hbm [shape: f32[4,128], index: 0, kind: input, shape index: {}]   ;;  %s145_s1 = inlined_call_operand.vmem [shape: f32[1,128], index: 1, kind: input, shape index: {}]   ;;  %s146_s2 = inlined_call_operand.hbm [shape: f32[4,128], index: 2, kind: output, shape index: {}]  }
   0x1   :  { %8 = vsyncpa [#allocation4], 0  ;;  %s100_s9 = smov [#allocation2]   ;;  %s52_s13 = scalar_lea.hbm %s144_s0, 64 }
   0x2   :  { %s15_s10 = sshll.u32 %s100_s9, 4  ;;  %p53_p0 = scmp.ne.s32.totalorder %s144_s0, %s52_s13  ;;  %s16_s10 = int_to_ptr.vmem [resolvable:$true] %s15_s10 }
   0x3   :  { %p56_p1 = scmp.lt.u32.totalorder %s52_s13, %s144_s0 }
   0x5   :  { %p58_p2 = pnand %p56_p1, %p53_p0 }
   0x7   :  { %61 = shalt.err (!%p58_p2)
}
   0x8   :  { %s62_s18 = scalar_lea.vmem %s16_s10, 64  ;;  %p67_p4 = scmp.lt.s32.totalorder %s16_s10, %s16_s10 }
   0x9   :  { %p63_p3 = scmp.ne.s32.totalorder %s16_s10, %s62_s18  ;;  %p68_p5 = scmp.lt.s32.totalorder %s62_s18, %s62_s18 }
   0xb   :  { %p69_p6 = por %p68_p5, %p67_p4 }
   0xd   :  { %p70_p7 = pnand %p69_p6, %p63_p3 }
   0xf   :  { %73 = shalt.err (!%p70_p7)
}
  0x10   :  { %18 = dma.hbm_to_vmem [thread:$0]  %s144_s0, 64, %s16_s10, [#allocation3]  }
  0x11   :  { %96 = dma.done.wait [#allocation3], 64  }
  0x12   :  { %97 = vsyncadd [#allocation3], 4294967232  ;;  %s101_s21 = smov [#allocation5]   ;;  %v24_v0 = vld [vmem:[#allocation2] sm:$0xf] }
  0x13   :  { %s40_s22 = sshll.u32 %s101_s21, 4  ;;  %v49_v1 = vld [vmem:[%s145_s1] ss:$0 sm:$0xff]  ;;  %s41_s22 = int_to_ptr.vmem [resolvable:$true] %s40_s22 }
  0x14   :  { %v32_v2 = vmul.f32 %v49_v1, %v24_v0  ;;  %s74_s25 = scalar_lea.vmem %s41_s22, 64  ;;  %p79_p9 = scmp.lt.s32.totalorder %s41_s22, %s41_s22 }
  0x15   :  { %p75_p8 = scmp.ne.s32.totalorder %s41_s22, %s74_s25  ;;  %p80_p10 = scmp.lt.s32.totalorder %s74_s25, %s74_s25 }
  0x16   :  { %33 = vst [vmem:[#allocation5] sm:$0xf] %v32_v2 }
  0x17   :  { %p81_p11 = por %p80_p10, %p79_p9 }
  0x19   :  { %p82_p12 = pnand %p81_p11, %p75_p8 }
  0x1b   :  { %85 = shalt.err (!%p82_p12)
}
  0x1c   :  { %s86_s27 = scalar_lea.hbm %s146_s2, 64 }
  0x1d   :  { %p87_p13 = scmp.ne.s32.totalorder %s146_s2, %s86_s27  ;;  %p90_p0 = scmp.lt.u32.totalorder %s86_s27, %s146_s2 }
  0x1f   :  { %p92_p1 = pnand %p90_p0, %p87_p13 }
  0x21   :  { %95 = shalt.err (!%p92_p1)
}
  0x22   :  { %43 = dma.vmem_to_hbm [thread:$0]  %s41_s22, 64, %s146_s2, [#allocation4]  }
  0x23   :  { %98 = dma.done.wait [#allocation4], 64  }
  0x24   :  { %99 = vsyncadd [#allocation4], 4294967232 }
  0x25   :  { %47 = vsyncpa [#allocation3], 1 }
  0x26   :  { %48 = vsyncpa [#allocation4], 1 }

</bundles_post_ra>
